<compile_context>
chip_gen: v6e
topology: v6e:2x2x1
jax: 0.10.0
libtpu: 0.0.40
codegen_flags: <defaults>
</compile_context>

<pallas_src>
import numpy as np
import jax
import jax.numpy as jnp
from jax.experimental import pallas as pl
from jax.experimental.pallas import tpu as pltpu


def _make_c_table() -> np.ndarray:
    """Exact replica of Utils.c_table from the PyTorch module."""
    c_table = np.empty((8, 8), dtype=np.float32)
    c_table.fill(99)
    c_table[:4, :4] = np.array(
        [[17, 18, 24, 47],
         [18, 21, 26, 66],
         [24, 26, 56, 99],
         [47, 66, 99, 99]], dtype=np.float32).T
    return c_table


_C_TABLE = _make_c_table()             # (8, 8) float32
_C_TABLE_FLAT = _C_TABLE.reshape(-1)   # (64,) — repeat period along the flat axis

_LANE_CANDIDATES = (2048, 1024, 512, 256, 128)


def _deq_kernel(x_ref, t_ref, o_ref):
    # x_ref: (TR, C) image row-block (input dtype)
    # t_ref: (1, C)  tiled dequantization table, f32 (resident; same block every step)
    # o_ref: (TR, C) output block (promoted dtype)
    o_ref[...] = (x_ref[...].astype(jnp.float32) * t_ref[...]).astype(o_ref.dtype)


def _choose_layout(total: int, in_itemsize: int):
    """Pick a lane-dense 2D view (R, C), the row tile TR and the grid length.

    C: multiple of 128 (unmasked stores) and of 64 (table period). If nothing
       divides `total` (odd 8x8-block count), fall back to C=512 + pad so the
       hot path stays unmasked.
    TR: multiple of the packed-vreg sublane height for the input dtype, sized
       for ~4 MiB per operand block, capped so the parallel axis keeps >= 4
       steps (v7x 2-TC balance). The last row block may be ragged (masked).
    """
    C = None
    for cand in _LANE_CANDIDATES:
        if total % cand == 0:
            C = cand
            break
    if C is None:
        C = 512  # pad path: total is a multiple of 64 but not of 128

    padded_total = pl.cdiv(total, C) * C
    pad = padded_total - total
    R = padded_total // C

    min_rows = {1: 32, 2: 16, 4: 8}.get(in_itemsize, 8)
    target_rows = max(min_rows, (4 << 20) // (C * in_itemsize))   # ~4 MiB / operand

    if R <= min_rows:
        TR = R                                  # full dim: always a legal block shape
    else:
        TR = max(min_rows, (min(target_rows, R) // min_rows) * min_rows)
        if R >= 4 * min_rows:
            # keep >= 4 grid steps so the megacore split (v7x) stays balanced
            tr_cap = max(min_rows, ((R // 4) // min_rows) * min_rows)
            TR = min(TR, tr_cap)

    grid = pl.cdiv(R, TR)
    return C, pad, R, TR, grid


def c_dequantize(image, factor=1.0, *, donate_image=False):
    """Dequantize CbCr channel: image * (c_table * factor).

    image: (..., 8, 8)  (e.g. batch x num_blocks x 8 x 8)
    factor: static Python scalar (as in the PyTorch module).
    donate_image: if True (and dtypes match), alias the output onto the input
                  buffer (caller must donate `image`).
    """
    assert image.shape[-2:] == (8, 8), "c_dequantize expects trailing (8, 8) blocks"

    orig_shape = image.shape
    in_dtype = image.dtype
    out_dtype = jnp.promote_types(in_dtype, jnp.float32)   # PyTorch promotion vs f32 table
    in_itemsize = jnp.dtype(in_dtype).itemsize
    out_itemsize = jnp.dtype(out_dtype).itemsize
    total = int(np.prod(orig_shape))

    C, pad, R, TR, grid = _choose_layout(total, in_itemsize)

    # Flatten (free contiguous view); only in the rare odd-block-count case pad
    # by < C elements so every row is lane-dense / unmasked.
    flat = image.reshape(-1)
    if pad:
        flat = jnp.pad(flat, (0, pad))
    x2d = flat.reshape(R, C)

    # Table built on the host (numpy): 64-value period tiled along lanes.
    factor = float(factor)
    table_row = np.tile(_C_TABLE_FLAT * np.float32(factor), C // 64).reshape(1, C)
    table2d = jnp.asarray(table_row, dtype=jnp.float32)

    io_aliases = {0: 0} if (donate_image and out_dtype == in_dtype) else {}

    out2d = pl.pallas_call(
        _deq_kernel,
        out_shape=jax.ShapeDtypeStruct((R, C), out_dtype),
        grid=(grid,),
        in_specs=[
            pl.BlockSpec((TR, C), lambda i: (i, 0)),   # image row-block, lane-dense
            pl.BlockSpec((1, C), lambda i: (0, 0)),    # resident table (never re-DMA'd)
        ],
        out_specs=pl.BlockSpec((TR, C), lambda i: (i, 0)),
        input_output_aliases=io_aliases,
        compiler_params=pltpu.CompilerParams(
            dimension_semantics=("parallel",),          # megacore-splittable on v7x
            vmem_limit_bytes=48 * 1024 * 1024,          # 4x ~4 MiB blocks, fits 64 MiB VMEM
        ),
        cost_estimate=pl.CostEstimate(
            flops=total,
            transcendentals=0,
            bytes_accessed=total * (in_itemsize + out_itemsize) + C * 4,
        ),
    )(x2d, table2d)

    out = out2d.reshape(-1)
    if pad:
        out = out[:total]
    return out.reshape(orig_shape)


def _reference(image, factor=1.0):
    # Pure-JAX reference mirroring the PyTorch forward (f32 table parameter).
    return image * (jnp.asarray(_C_TABLE) * jnp.float32(factor))


if __name__ == "__main__":
    key = jax.random.PRNGKey(0)

    # Primary case: batch x num_blocks x 8 x 8, even block count (no padding).
    B, NBLOCKS = 2, 4
    image = jax.random.normal(key, (B, NBLOCKS, 8, 8), dtype=jnp.float32)
    factor = 2.0
    out = jax.block_until_ready(c_dequantize(image, factor))
    ref = _reference(image, factor)
    assert out.shape == image.shape and out.dtype == ref.dtype
    assert jnp.allclose(out, ref), "mismatch vs reference (primary case)"

    # Edge case: odd number of 8x8 blocks (total % 128 == 64) -> padded lane-dense path.
    image_odd = jax.random.normal(jax.random.PRNGKey(1), (1, 3, 8, 8), dtype=jnp.float32)
    out_odd = jax.block_until_ready(c_dequantize(image_odd, 1.0))
    assert jnp.allclose(out_odd, _reference(image_odd, 1.0)), "mismatch vs reference (odd block count)"

    print("KERNEL_OK")
</pallas_src>

<mosaic_0001>
module attributes {stable_mosaic.version = 11 : i64} {
  func.func @_deq_kernel(%arg0: i32, %arg1: memref<1x512xf32, #tpu.memory_space<vmem>>, %arg2: memref<1x512xf32, #tpu.memory_space<vmem>>, %arg3: memref<1x512xf32, #tpu.memory_space<vmem>>) attributes {dimension_semantics = [#tpu.dimension_semantics<parallel>], iteration_bounds = array<i64: 1>, scalar_prefetch = 0 : i64, scratch_operands = 0 : i64, tpu.core_type = #tpu.core_type<tc>, window_params = [{transform_indices = @transform_0, window_bounds = array<i64: 1, 512>}, {pipeline_mode = #tpu.pipeline_mode<synchronous>, transform_indices = @transform_1, window_bounds = array<i64: 1, 512>}, {transform_indices = @transform_2, window_bounds = array<i64: 1, 512>}]} {
    %c0 = arith.constant 0 : index
    %c0_0 = arith.constant 0 : index
    %0 = vector.load %arg1[%c0, %c0_0] : memref<1x512xf32, #tpu.memory_space<vmem>>, vector<1x512xf32>
    %c0_1 = arith.constant 0 : index
    %c0_2 = arith.constant 0 : index
    %1 = vector.load %arg2[%c0_1, %c0_2] : memref<1x512xf32, #tpu.memory_space<vmem>>, vector<1x512xf32>
    %2 = arith.mulf %0, %1 : vector<1x512xf32>
    %c0_3 = arith.constant 0 : index
    %c0_4 = arith.constant 0 : index
    %3 = vector.load %arg3[%c0_3, %c0_4] : memref<1x512xf32, #tpu.memory_space<vmem>>, vector<1x512xf32>
    tpu.vector_store %arg3[%c0_3, %c0_4], %2 {strides = array<i32>} : memref<1x512xf32, #tpu.memory_space<vmem>>, vector<1x512xf32>,
    return
  }
  func.func @transform_0(%arg0: i32) -> (i32, i32) {
    %c0_i32 = arith.constant 0 : i32
    %c0_i32_0 = arith.constant 0 : i32
    return %arg0, %c0_i32 : i32, i32
  }
  func.func @transform_1(%arg0: i32) -> (i32, i32) {
    %c0_i32 = arith.constant 0 : i32
    %c0_i32_0 = arith.constant 0 : i32
    %c0_i32_1 = arith.constant 0 : i32
    return %c0_i32, %c0_i32_0 : i32, i32
  }
  func.func @transform_2(%arg0: i32) -> (i32, i32) {
    %c0_i32 = arith.constant 0 : i32
    %c0_i32_0 = arith.constant 0 : i32
    return %arg0, %c0_i32 : i32, i32
  }
}

</mosaic_0001>

<bundles_post_ra>
// kernel: tpu_custom_call.1
= control target key start
LH: loop header
LB: loop body
LE: loop exit
PB: predicated region body
PF: predicated region fallthrough
CT: control target
= control target key end

     0   :  { %7 = vsyncpa [#allocation3], 0  ;;  %s156_s0 = inlined_call_operand.hbm [shape: f32[1,512], index: 0, kind: input, shape index: {}]   ;;  %s157_s1 = inlined_call_operand.hbm [shape: f32[1,512], index: 1, kind: input, shape index: {}]   ;;  %s158_s2 = inlined_call_operand.hbm [shape: f32[1,512], index: 2, kind: output, shape index: {}]  }
   0x1   :  { %8 = vsyncpa [#allocation6], 0 }
   0x2   :  { %9 = vsyncpa [#allocation4], 0  ;;  %s129_s9 = smov [#allocation2]   ;;  %s130_s11 = smov [#allocation5]  }
   0x3   :  { %s16_s10 = sshll.u32 %s129_s9, 4  ;;  %s26_s12 = sshll.u32 %s130_s11, 4  ;;  %s17_s10 = int_to_ptr.vmem [resolvable:$true] %s16_s10  ;;  %s27_s12 = int_to_ptr.vmem [resolvable:$true] %s26_s12 }
   0x4   :  { %s71_s13 = scalar_lea.vmem %s17_s10, 64  ;;  %p76_p1 = scmp.lt.s32.totalorder %s17_s10, %s17_s10 }
   0x5   :  { %p72_p0 = scmp.ne.s32.totalorder %s17_s10, %s71_s13  ;;  %p77_p2 = scmp.lt.s32.totalorder %s71_s13, %s71_s13 }
   0x7   :  { %p78_p3 = por %p77_p2, %p76_p1 }
   0x9   :  { %p79_p4 = pnand %p78_p3, %p72_p0 }
   0xb   :  { %82 = shalt.err (!%p79_p4)
}
   0xc   :  { %19 = dma.hbm_to_vmem [thread:$0]  %s156_s0, 64, %s17_s10, [#allocation3]  }
   0xd   :  { %s91_s16 = scalar_lea.vmem %s27_s12, 64  ;;  %p96_p6 = scmp.lt.s32.totalorder %s27_s12, %s27_s12 }
   0xe   :  { %p92_p5 = scmp.ne.s32.totalorder %s27_s12, %s91_s16  ;;  %p97_p7 = scmp.lt.s32.totalorder %s91_s16, %s91_s16 }
  0x10   :  { %p98_p8 = por %p97_p7, %p96_p6 }
  0x12   :  { %p99_p9 = pnand %p98_p8, %p92_p5 }
  0x14   :  { %102 = shalt.err (!%p99_p9)
}
  0x15   :  { %29 = dma.hbm_to_vmem [thread:$0]  %s157_s1, 64, %s27_s12, [#allocation6]  }
  0x16   :  { %123 = dma.done.wait [#allocation3], 64  }
  0x17   :  { %124 = vsyncadd [#allocation3], 4294967232 }
  0x18   :  { %125 = dma.done.wait [#allocation6], 64  }
  0x19   :  { %126 = vsyncadd [#allocation6], 4294967232  ;;  %v39_v0 = vlaneseq  ;;  %s131_s19 = smov [#allocation7]   ;;  %v36_v1 = vld [vmem:[#allocation2] sm:$0xf] }
  0x1a   :  { %s50_s20 = sshll.u32 %s131_s19, 4  ;;  %v37_v2 = vld [vmem:[#allocation5] sm:$0xf]  ;;  %s51_s20 = int_to_ptr.vmem [resolvable:$true] %s50_s20 }
  0x1b   :  { %vm41_vm0 = vcmp.lt.s32.totalorder %v39_v0, 512  ;;  %v38_v3 = vmul.f32 %v37_v2, %v36_v1  ;;  %s103_s0 = scalar_lea.vmem %s51_s20, 64  ;;  %p108_p11 = scmp.lt.s32.totalorder %s51_s20, %s51_s20 }
  0x1c   :  { %p104_p10 = scmp.ne.s32.totalorder %s51_s20, %s103_s0  ;;  %p109_p12 = scmp.lt.s32.totalorder %s103_s0, %s103_s0 }
  0x1d   :  { %43 = vst.msk [vmem:[#allocation7] sm:$0xf] %vm41_vm0, %v38_v3 }
  0x1e   :  { %p110_p13 = por %p109_p12, %p108_p11 }
  0x20   :  { %p111_p0 = pnand %p110_p13, %p104_p10 }
  0x22   :  { %114 = shalt.err (!%p111_p0)
}
  0x23   :  { %53 = dma.vmem_to_hbm [thread:$0]  %s51_s20, 64, %s158_s2, [#allocation4]  }
  0x24   :  { %127 = dma.done.wait [#allocation4], 64  }
  0x25   :  { %128 = vsyncadd [#allocation4], 4294967232 }
  0x26   :  { %57 = vsyncpa [#allocation3], 1 }
  0x27   :  { %58 = vsyncpa [#allocation6], 1 }
  0x28   :  { %59 = vsyncpa [#allocation4], 1 }

</bundles_post_ra>
